<compile_context>
chip_gen: v6e
topology: v6e:2x2x1
jax: 0.10.0
libtpu: 0.0.40
codegen_flags: <defaults>
</compile_context>

<pallas_src>
import numpy as np
import jax
import jax.numpy as jnp
from jax.experimental import pallas as pl
from jax.experimental.pallas import tpu as pltpu

_LANE = 128          # vreg lane width
_MAX_SUBLANE = 32    # worst-case packed sublane count (int8/fp8)


def _sublane(dtype) -> int:
    """Packed sublane count: 8 for 4-byte, 16 for 2-byte, 32 for 1-byte dtypes."""
    return max(8, 32 // jnp.dtype(dtype).itemsize)


def _round_up(x: int, m: int) -> int:
    return (x + m - 1) // m * m


def _pe_table_np(max_len: int, embed_dim: int) -> np.ndarray:
    """Deterministic sin/cos positional-encoding table, (max_len, embed_dim) f32."""
    pos = np.arange(0, max_len, dtype=np.float32)[:, None]
    div_term = np.exp(np.arange(0, embed_dim, 2, dtype=np.float32)
                      * (-np.log(10000.0) / embed_dim))
    pe = np.zeros((max_len, embed_dim), dtype=np.float32)
    pe[:, 0::2] = np.sin(pos * div_term)
    pe[:, 1::2] = np.cos(pos * div_term)
    return pe


def init_positional_encoding(max_len: int, embed_dim: int, dtype=jnp.float32):
    """Parameter setup (== nn.Module.__init__).

    pe is stored pre-folded as a lane-dense (1, R_max, 128) slab in the activation
    dtype (matches pe.type_as(x) and lets the forward pass it straight into
    pallas_call with no slice/cast/copy).  R_max is padded to a multiple of 32 so
    any sublane-rounded row tile of the first R <= R_max rows is always in bounds.
    """
    pe = _pe_table_np(max_len, embed_dim).reshape(-1)            # row-major flatten
    n_pad = _round_up(pe.size, _MAX_SUBLANE * _LANE) - pe.size
    if n_pad:
        pe = np.concatenate([pe, np.zeros((n_pad,), np.float32)])
    pe_flat = jnp.asarray(pe.reshape(1, -1, _LANE), dtype=dtype)
    alpha = jnp.ones((1,), dtype=jnp.float32)                    # nn.Parameter(torch.ones(1))
    return {"pe_flat": pe_flat, "alpha": alpha,
            "max_len": max_len, "embed_dim": embed_dim}


def _pe_add_kernel(alpha_ref, x_ref, pe_ref, o_ref):
    # alpha_ref: SMEM (1,) f32; x_ref / o_ref: VMEM (Bt, Rt, 128); pe_ref: (1, Rt, 128).
    # f32 compute (free on an HBM-bound kernel), cast only on the store.
    a = alpha_ref[0]
    o_ref[...] = (x_ref[...].astype(jnp.float32)
                  + a * pe_ref[...].astype(jnp.float32)).astype(o_ref.dtype)


def positional_encoding_forward(x: jnp.ndarray,
                                params: dict,
                                *,
                                target_tile_bytes: int = 2 << 20,
                                donate_x: bool = False) -> jnp.ndarray:
    """x: (B, T, D); params from init_positional_encoding.

    donate_x=True aliases x's folded buffer to the output.  It only saves an HBM
    allocation if the caller truly donates x at the jax.jit boundary
    (donate_argnums); otherwise XLA inserts a defensive copy and it buys nothing.
    """
    B, T, D = x.shape
    if T > params["max_len"]:
        raise ValueError(f"sequence length {T} exceeds max_len {params['max_len']}")
    if D != params["embed_dim"]:
        raise ValueError(f"embed_dim mismatch: {D} vs {params['embed_dim']}")

    pe_flat = params["pe_flat"]
    if pe_flat.dtype != x.dtype:
        # Matches pe.type_as(x).  Store pe in the activation dtype at setup to avoid this pass.
        pe_flat = pe_flat.astype(x.dtype)
    alpha = jnp.asarray(params["alpha"], dtype=jnp.float32).reshape((1,))

    itemsize = jnp.dtype(x.dtype).itemsize
    sub = _sublane(x.dtype)

    # Lane-dense fold: (B, T, D) -> (B, R, 128) with R a multiple of the packed
    # sublane count.  Free when T*D divides sub*128; otherwise one zero-pad keeps
    # the store path unmasked.  Prefix-preserving, so it aligns with pe_flat.
    N = T * D
    Np = _round_up(N, sub * _LANE)
    R = Np // _LANE
    xf = x.reshape(B, N)
    if Np != N:
        xf = jnp.pad(xf, ((0, 0), (0, Np - N)))
    x2 = xf.reshape(B, R, _LANE)
    # pe_flat has round_up(ceil(max_len*D/128), 32) >= R rows, so every pe block
    # of the first R rows is in bounds (partial trailing blocks are fine).

    row_bytes = _LANE * itemsize

    # Batch tile: whole batch in one block when a minimal-height tile fits the
    # budget (pe fetched exactly once per row tile, B x fewer grid steps);
    # otherwise tile the batch as well.
    min_rows = min(R, sub)
    if B * min_rows * row_bytes <= 4 * target_tile_bytes:
        Bt = B
    else:
        Bt = max(1, target_tile_bytes // (min_rows * row_bytes))
    num_b = pl.cdiv(B, Bt)

    # Row tile: ~target_tile_bytes per x tile, multiple of the packed sublane
    # count, balanced so the trailing tile is not a tiny partial block.
    rows = max(sub, (target_tile_bytes // (Bt * row_bytes)) // sub * sub)
    if rows >= R:
        Rt = R
    else:
        Rt = min(R, _round_up(pl.cdiv(R, pl.cdiv(R, rows)), sub))
    num_r = pl.cdiv(R, Rt)

    extra_kwargs = {}
    if donate_x:
        extra_kwargs["input_output_aliases"] = {1: 0}   # x2 (input #1) -> output #0

    out2 = pl.pallas_call(
        _pe_add_kernel,
        out_shape=jax.ShapeDtypeStruct((B, R, _LANE), x.dtype),
        grid=(num_r, num_b),                                       # row-tile outer, batch inner
        in_specs=[
            pl.BlockSpec(memory_space=pltpu.SMEM),                  # alpha scalar
            pl.BlockSpec((Bt, Rt, _LANE), lambda t, b: (b, t, 0)),  # x tile
            pl.BlockSpec((1, Rt, _LANE), lambda t, b: (0, t, 0)),   # pe tile (const over b)
        ],
        out_specs=pl.BlockSpec((Bt, Rt, _LANE), lambda t, b: (b, t, 0)),
        compiler_params=pltpu.CompilerParams(
            dimension_semantics=("parallel", "parallel"),
            # 3 operands x double-buffer at ~2 MiB tiles ~= 10 MiB; 48 MiB cap is
            # generous on v5e/v6e (128 MiB physical) and safe on v7x (64 MiB).
            vmem_limit_bytes=48 * 1024 * 1024),
        **extra_kwargs,
    )(alpha, x2, pe_flat)

    out = out2.reshape(B, Np)
    if Np != N:
        out = out[:, :N]
    return out.reshape(B, T, D)


if __name__ == "__main__":
    key = jax.random.PRNGKey(0)

    # ---- Test 1: small shapes matching the module's forward (batch, seq, embed_dim) ----
    B, T, D, MAX_LEN = 2, 8, 32, 16
    x = jax.random.normal(key, (B, T, D), dtype=jnp.float32)
    params = init_positional_encoding(MAX_LEN, D, dtype=x.dtype)

    out = positional_encoding_forward(x, params)
    out = jax.block_until_ready(out)

    pe_ref = jnp.asarray(_pe_table_np(MAX_LEN, D))[None]           # (1, max_len, D)
    ref = x + params["alpha"][0] * pe_ref[:, :T, :].astype(x.dtype)
    np.testing.assert_allclose(np.asarray(out), np.asarray(ref), rtol=1e-6, atol=1e-6)

    # ---- Test 2: multi-row-tile grid + pe block reuse (tiny tiles forced on purpose) ----
    B2, T2, D2 = 3, 40, 128
    x2 = jax.random.normal(jax.random.PRNGKey(1), (B2, T2, D2), dtype=jnp.float32)
    params2 = init_positional_encoding(64, D2, dtype=x2.dtype)
    params2["alpha"] = jnp.asarray([0.5], dtype=jnp.float32)

    out2 = positional_encoding_forward(x2, params2, target_tile_bytes=8192)
    out2 = jax.block_until_ready(out2)

    pe_ref2 = jnp.asarray(_pe_table_np(64, D2))[None]
    ref2 = x2 + params2["alpha"][0] * pe_ref2[:, :T2, :].astype(x2.dtype)
    np.testing.assert_allclose(np.asarray(out2), np.asarray(ref2), rtol=1e-6, atol=1e-6)

    # ---- Test 3: non-lane-aligned T*D exercises the zero-pad fallback path ----
    B3, T3, D3 = 2, 5, 24
    x3 = jax.random.normal(jax.random.PRNGKey(2), (B3, T3, D3), dtype=jnp.float32)
    params3 = init_positional_encoding(10, D3, dtype=x3.dtype)
    params3["alpha"] = jnp.asarray([1.5], dtype=jnp.float32)

    out3 = positional_encoding_forward(x3, params3)
    out3 = jax.block_until_ready(out3)

    pe_ref3 = jnp.asarray(_pe_table_np(10, D3))[None]
    ref3 = x3 + params3["alpha"][0] * pe_ref3[:, :T3, :].astype(x3.dtype)
    np.testing.assert_allclose(np.asarray(out3), np.asarray(ref3), rtol=1e-6, atol=1e-6)

    print("KERNEL_OK")
</pallas_src>

<mosaic_0001>
module attributes {stable_mosaic.version = 11 : i64} {
  func.func @_pe_add_kernel(%arg0: i32, %arg1: i32, %arg2: memref<1xf32, #tpu.memory_space<smem>>, %arg3: memref<2x8x128xf32, #tpu.memory_space<vmem>>, %arg4: memref<1x8x128xf32, #tpu.memory_space<vmem>>, %arg5: memref<2x8x128xf32, #tpu.memory_space<vmem>>) attributes {dimension_semantics = [#tpu.dimension_semantics<parallel>, #tpu.dimension_semantics<parallel>], iteration_bounds = array<i64: 1, 1>, scalar_prefetch = 0 : i64, scratch_operands = 0 : i64, tpu.core_type = #tpu.core_type<tc>, window_params = [{transform_indices = @transform_0, window_bounds = array<i64: 1>}, {transform_indices = @transform_1, window_bounds = array<i64: 2, 8, 128>}, {transform_indices = @transform_2, window_bounds = array<i64: 1, 8, 128>}, {transform_indices = @transform_3, window_bounds = array<i64: 2, 8, 128>}]} {
    %c0 = arith.constant 0 : index
    %0 = memref.load %arg2[%c0] : memref<1xf32, #tpu.memory_space<smem>>
    %c0_0 = arith.constant 0 : index
    %c0_1 = arith.constant 0 : index
    %c0_2 = arith.constant 0 : index
    %1 = vector.load %arg3[%c0_0, %c0_1, %c0_2] : memref<2x8x128xf32, #tpu.memory_space<vmem>>, vector<2x8x128xf32>
    %c0_3 = arith.constant 0 : index
    %c0_4 = arith.constant 0 : index
    %c0_5 = arith.constant 0 : index
    %2 = vector.load %arg4[%c0_3, %c0_4, %c0_5] : memref<1x8x128xf32, #tpu.memory_space<vmem>>, vector<1x8x128xf32>
    %3 = vector.broadcast %0 : f32 to vector<1x8x128xf32>
    %4 = arith.mulf %3, %2 : vector<1x8x128xf32>
    %5 = vector.broadcast %4 : vector<1x8x128xf32> to vector<2x8x128xf32>
    %6 = arith.addf %1, %5 : vector<2x8x128xf32>
    %c0_6 = arith.constant 0 : index
    %c0_7 = arith.constant 0 : index
    %c0_8 = arith.constant 0 : index
    %7 = vector.load %arg5[%c0_6, %c0_7, %c0_8] : memref<2x8x128xf32, #tpu.memory_space<vmem>>, vector<2x8x128xf32>
    tpu.vector_store %arg5[%c0_6, %c0_7, %c0_8], %6 {strides = array<i32>} : memref<2x8x128xf32, #tpu.memory_space<vmem>>, vector<2x8x128xf32>,
    return
  }
  func.func @transform_0(%arg0: i32, %arg1: i32) -> i32 {
    %c0_i32 = arith.constant 0 : i32
    %c0_i32_0 = arith.constant 0 : i32
    return %c0_i32 : i32
  }
  func.func @transform_1(%arg0: i32, %arg1: i32) -> (i32, i32, i32) {
    %c0_i32 = arith.constant 0 : i32
    %c0_i32_0 = arith.constant 0 : i32
    return %arg1, %arg0, %c0_i32 : i32, i32, i32
  }
  func.func @transform_2(%arg0: i32, %arg1: i32) -> (i32, i32, i32) {
    %c0_i32 = arith.constant 0 : i32
    %c0_i32_0 = arith.constant 0 : i32
    %c0_i32_1 = arith.constant 0 : i32
    return %c0_i32, %arg0, %c0_i32_0 : i32, i32, i32
  }
  func.func @transform_3(%arg0: i32, %arg1: i32) -> (i32, i32, i32) {
    %c0_i32 = arith.constant 0 : i32
    %c0_i32_0 = arith.constant 0 : i32
    return %arg1, %arg0, %c0_i32 : i32, i32, i32
  }
}

</mosaic_0001>

<bundles_post_ra>
// kernel: tpu_custom_call.1
= control target key start
LH: loop header
LB: loop body
LE: loop exit
PB: predicated region body
PF: predicated region fallthrough
CT: control target
= control target key end

     0   :  { %9 = vsyncpa [#allocation4], 0  ;;  %s184_s0 = inlined_call_operand.<no memory space> [shape: f32[1], index: 0, kind: input, shape index: {}]   ;;  %s185_s1 = inlined_call_operand.hbm [shape: f32[2,8,128], index: 1, kind: input, shape index: {}]   ;;  %s186_s2 = inlined_call_operand.hbm [shape: f32[1,32,128], index: 2, kind: input, shape index: {}]   ;;  %s187_s3 = inlined_call_operand.hbm [shape: f32[2,8,128], index: 3, kind: output, shape index: {}]  }
   0x1   :  { %10 = vsyncpa [#allocation7], 0 }
   0x2   :  { %11 = vsyncpa [#allocation5], 0  ;;  %s141_s12 = smov [#allocation3]  }
   0x3   :  { %s19_s13 = sshll.u32 %s141_s12, 4  ;;  %s20_s13 = int_to_ptr.vmem [resolvable:$true] %s19_s13 }
   0x4   :  { %s83_s14 = scalar_lea.vmem %s20_s13, 256  ;;  %p88_p1 = scmp.lt.s32.totalorder %s20_s13, %s20_s13 }
   0x5   :  { %p84_p0 = scmp.ne.s32.totalorder %s20_s13, %s83_s14  ;;  %p89_p2 = scmp.lt.s32.totalorder %s83_s14, %s83_s14 }
   0x7   :  { %p90_p3 = por %p89_p2, %p88_p1 }
   0x9   :  { %p91_p4 = pnand %p90_p3, %p84_p0 }
   0xb   :  { %94 = shalt.err (!%p91_p4)
}
   0xc   :  { %s142_s15 = smov 128   ;;  %s143_s16 = smov 8  }
   0xd   :  { %25 = dma.hbm_to_vmem [thread:$0]  %s185_s1, 256, %s20_s13, [#allocation4], %s142_s15, %s142_s15, %s143_s16  }
   0xe   :  { %s144_s19 = smov [#allocation6]  }
   0xf   :  { %s32_s20 = sshll.u32 %s144_s19, 4  ;;  %s33_s20 = int_to_ptr.vmem [resolvable:$true] %s32_s20 }
  0x10   :  { %s103_s21 = scalar_lea.vmem %s33_s20, 128  ;;  %p108_p6 = scmp.lt.s32.totalorder %s33_s20, %s33_s20 }
  0x11   :  { %p104_p5 = scmp.ne.s32.totalorder %s33_s20, %s103_s21  ;;  %p109_p7 = scmp.lt.s32.totalorder %s103_s21, %s103_s21 }
  0x13   :  { %p110_p8 = por %p109_p7, %p108_p6 }
  0x15   :  { %p111_p9 = pnand %p110_p8, %p104_p5 }
  0x17   :  { %114 = shalt.err (!%p111_p9)
}
  0x18   :  { %35 = dma.hbm_to_vmem [thread:$0]  %s186_s2, 128, %s33_s20, [#allocation7]  }
  0x19   :  { %135 = dma.done.wait [#allocation4], 256  }
  0x1a   :  { %136 = vsyncadd [#allocation4], 4294967040 }
  0x1b   :  { %137 = dma.done.wait [#allocation7], 128  }
  0x1c   :  { %138 = vsyncadd [#allocation7], 4294967168  ;;  %v46_v0 = vstv %s184_s0  ;;  %v43_v1 = vld [vmem:[#allocation3] sm:$0xff]  ;;  %v45_v2 = vld [vmem:[#allocation6] sm:$0xff]  ;;  %s145_s25 = smov [#allocation8]  }
  0x1d   :  { %v44_v3 = vld [vmem:[#allocation3 + $0x8] sm:$0xff]  ;;  %s57_s26 = sshll.u32 %s145_s25, 4  ;;  %v47_v4 = vmul.f32 %v46_v0, %v45_v2  ;;  %s58_s26 = int_to_ptr.vmem [resolvable:$true] %s57_s26 }
  0x1e   :  { %s115_s2 = scalar_lea.vmem %s58_s26, 256  ;;  %p120_p11 = scmp.lt.s32.totalorder %s58_s26, %s58_s26 }
  0x1f   :  { %v48_v5 = vadd.f32 %v47_v4, %v43_v1  ;;  %v49_v6 = vadd.f32 %v47_v4, %v44_v3  ;;  %p116_p10 = scmp.ne.s32.totalorder %s58_s26, %s115_s2  ;;  %p121_p12 = scmp.lt.s32.totalorder %s115_s2, %s115_s2 }
  0x21   :  { %50 = vst [vmem:[#allocation8] sm:$0xff] %v48_v5  ;;  %51 = vst [vmem:[#allocation8 + $0x8] sm:$0xff] %v49_v6  ;;  %p122_p13 = por %p121_p12, %p120_p11 }
  0x23   :  { %p123_p0 = pnand %p122_p13, %p116_p10 }
  0x25   :  { %126 = shalt.err (!%p123_p0)
}
  0x26   :  { %63 = dma.vmem_to_hbm [thread:$0]  %s58_s26, 256, %s187_s3, [#allocation5], %s142_s15, %s142_s15, %s143_s16  }
  0x27   :  { %139 = dma.done.wait [#allocation5], 256  }
  0x28   :  { %140 = vsyncadd [#allocation5], 4294967040 }
  0x29   :  { %67 = vsyncpa [#allocation4], 1 }
  0x2a   :  { %68 = vsyncpa [#allocation7], 1 }
  0x2b   :  { %69 = vsyncpa [#allocation5], 1 }

</bundles_post_ra>
